<compile_context>
chip_gen: v7x
topology: tpu7x:2x2x1
jax: 0.10.0
libtpu: 0.0.40
codegen_flags: <defaults>
</compile_context>

<pallas_src>
import functools

import jax
import jax.numpy as jnp
from jax.experimental import pallas as pl
from jax.experimental.pallas import tpu as pltpu

_MIB = 1024 * 1024
_LANES = 128


def glimpse_kernel(q_ref, refp_ref, maskp_ref, wq_tp_ref, bq_p_ref,
                   wref_bd_ref, bref_p_ref, v_bd_ref, neg_inf_expand_ref,
                   out_ref, *, inv_temp):
    Bt, Sg, GH = refp_ref.shape
    G = maskp_ref.shape[-1]
    H = GH // G

    # u1, lane-packed across the G blocks: (Bt, GH)
    u1p = jnp.dot(q_ref[...], wq_tp_ref[...],
                  preferred_element_type=jnp.float32) + bq_p_ref[...]

    # u2 for G sequence positions per row: one full-width MXU matmul against the
    # block-diagonal W_ref^T.  (Bt, Sg, GH) -> (Bt*Sg, GH) is a no-op view
    # because Sg is a multiple of 8.
    r2 = refp_ref[...].reshape(Bt * Sg, GH)
    u2p = (jnp.dot(r2, wref_bd_ref[...], preferred_element_type=jnp.float32)
           .reshape(Bt, Sg, GH) + bref_p_ref[...])                      # f32

    # tanh on VPU/EUP in f32; bf16 operand for the MXU matvec (values in [-1,1]).
    tb = jnp.tanh(u1p[:, None, :] + u2p).astype(jnp.bfloat16)           # (Bt, Sg, GH)

    # Per-position logits, already broadcast across the H lanes of their block:
    # u_exp[b, sg, g*H + j] = v . tanh(...)[b, s = sg*G + g, :]  for every j.
    u_exp = jnp.dot(tb.reshape(Bt * Sg, GH), v_bd_ref[...],
                    preferred_element_type=jnp.float32).reshape(Bt, Sg, GH)

    # Mask bias, expanded the same way by a tiny MXU matmul against a
    # (-inf)-scaled block-expansion matrix.
    bias_exp = jnp.dot(maskp_ref[...].reshape(Bt * Sg, G),
                       neg_inf_expand_ref[...],
                       preferred_element_type=jnp.float32).reshape(Bt, Sg, GH)

    # Temperature softmax over all sequence positions (sublane axis x lane
    # blocks).  Every logit is replicated H times along lanes, so the expanded
    # denominator equals H * the true one; fold the H into the (exact) divide.
    logits = (u_exp + bias_exp) * inv_temp
    m = jnp.max(logits, axis=2, keepdims=True)
    m = jnp.max(m, axis=1, keepdims=True)
    e = jnp.exp(logits - m)
    denom = jnp.sum(e, axis=2, keepdims=True)
    denom = jnp.sum(denom, axis=1, keepdims=True)
    a_exp = e * (float(H) / denom)

    # d-partials: VPU broadcast-multiply + sublane reduction; lane-dense store.
    # out[b, g*H + c] = sum_sg a[b, sg*G + g] * u2[b, sg*G + g, c]; the G-block
    # fold (sum over g) happens wrapper-side on a tiny (B, G, H) reshape.
    out_ref[...] = jnp.sum(a_exp * u2p, axis=1).astype(out_ref.dtype)


def _lane_pad(n):
    return ((n + _LANES - 1) // _LANES) * _LANES


def _pick_block_b(B, Sg, G, H, budget_bytes, n_ref_buf=2, min_grid_steps=2):
    """Largest batch tile whose VMEM working set fits `budget_bytes`.

    Accounts for 128-lane padding of the narrow (Sg, G) mask block and the
    peak-live f32/bf16 intermediates (u2 / tanh / logits / exp / product), and
    caps the tile so the grid has at least `min_grid_steps` steps when the batch
    allows it (DMA/compute overlap + both TensorCores on v7x).
    """
    GH = G * H
    per_row = (
        n_ref_buf * Sg * _lane_pad(GH) * 2            # ref blocks (bf16, pipelined)
        + 2 * Sg * _lane_pad(G) * 2                   # mask blocks (bf16, lane padded)
        + 2 * _lane_pad(H) * 2 + 2 * _lane_pad(GH) * 4  # q block + out block
        + 20 * Sg * _lane_pad(GH)                     # peak-live f32/bf16 intermediates
    )
    bt = max(1, int(budget_bytes) // per_row)
    if B <= 8:
        return B                                      # single step; block == full dim
    n_steps = max(min_grid_steps, pl.cdiv(B, max(8, min(bt, B))))
    bt = ((pl.cdiv(B, n_steps) + 7) // 8) * 8
    return min(bt, ((B + 7) // 8) * 8)


def _device_kind():
    try:
        return jax.devices()[0].device_kind.lower()
    except Exception:
        return ""


def glimpse(q, ref, mask, wq, bq, wref, bref, v, *,
            inf=1e8, temp=1.0, compute_dtype=jnp.bfloat16,
            block_b=None, vmem_limit_bytes=None):
    B, S, H = ref.shape

    # Lane-packing factor: fold G sequence positions into the 128-wide lane axis.
    G = (128 // H) if (H <= 128 and 128 % H == 0) else 1
    GH = G * H

    if mask is None:
        mask = jnp.zeros((B, S), dtype=jnp.float32)
    mask = mask.astype(jnp.float32)

    # ---- host-side layout plumbing (one-time weight prep + padding) ----
    # Pad S to a multiple of 8*G so the packed (B, S/G, G*H) view has a
    # sublane-aligned middle dim and every in-kernel reshape is a no-op view.
    # Padded positions get mask = 10 (10x the real mask scale) so they receive
    # exactly zero softmax weight, even when a row is fully masked.
    mult = 8 * G
    S_pad = ((S + mult - 1) // mult) * mult
    if S_pad != S:
        ref = jnp.pad(ref, ((0, 0), (0, S_pad - S), (0, 0)))
        mask = jnp.pad(mask, ((0, 0), (0, S_pad - S)), constant_values=10.0)
    Sg = S_pad // G

    # Per-generation VMEM budget: v7x has 64 MiB/TC, v5e/v6e have 128 MiB.
    kind = _device_kind()
    if vmem_limit_bytes is None:
        vmem_limit_bytes = 44 * _MIB if "v7" in kind else 80 * _MIB
    n_ref_buf = 3 if "v5" in kind else 2

    bt = block_b if block_b is not None else _pick_block_b(
        B, Sg, G, H, vmem_limit_bytes // 2, n_ref_buf=n_ref_buf)
    B_pad = pl.cdiv(B, bt) * bt
    if B_pad != B:
        q = jnp.pad(q, ((0, B_pad - B), (0, 0)))
        ref = jnp.pad(ref, ((0, B_pad - B), (0, 0), (0, 0)))
        mask = jnp.pad(mask, ((0, B_pad - B), (0, 0)))   # padded rows dropped below

    # Packed bf16 MXU operands; f32 biases; block-diagonal / lane-tiled weights.
    q_c = q.astype(compute_dtype)
    refp = ref.astype(compute_dtype).reshape(B_pad, Sg, GH)
    maskp = mask.reshape(B_pad, Sg, G).astype(compute_dtype)

    eye_g = jnp.eye(G, dtype=jnp.float32)
    wq_tp = jnp.tile(wq.T.astype(jnp.float32), (1, G)).astype(compute_dtype)     # (H, GH)
    wref_bd = jnp.kron(eye_g, wref.T.astype(jnp.float32)).astype(compute_dtype)  # (GH, GH)
    bq_p = jnp.tile(bq.astype(jnp.float32), G).reshape(1, GH)
    bref_p = jnp.tile(bref.astype(jnp.float32), G).reshape(1, GH)
    v_bd = jnp.kron(eye_g, v.astype(jnp.float32)[:, None]
                    * jnp.ones((1, H), jnp.float32)).astype(compute_dtype)       # (GH, GH)
    neg_inf_expand = ((-float(inf)) * jnp.repeat(eye_g, H, axis=1)
                      ).astype(compute_dtype)                                    # (G, GH)

    kernel = functools.partial(glimpse_kernel, inv_temp=float(1.0 / temp))

    ref_idx = lambda i: (i, 0, 0)
    if "v5" in kind:
        # Lowest HBM bandwidth generation: 3-deep buffering on the dominant DMA.
        try:
            ref_spec = pl.BlockSpec((bt, Sg, GH), ref_idx,
                                    pipeline_mode=pl.Buffered(3))
        except TypeError:
            ref_spec = pl.BlockSpec((bt, Sg, GH), ref_idx)
    else:
        ref_spec = pl.BlockSpec((bt, Sg, GH), ref_idx)

    out = pl.pallas_call(
        kernel,
        out_shape=jax.ShapeDtypeStruct((B_pad, GH), jnp.float32),
        grid_spec=pltpu.PrefetchScalarGridSpec(
            num_scalar_prefetch=0,
            grid=(B_pad // bt,),
            in_specs=[
                pl.BlockSpec((bt, H), lambda i: (i, 0)),            # q
                ref_spec,                                           # ref (lane-packed)
                pl.BlockSpec((bt, Sg, G), lambda i: (i, 0, 0)),     # mask (lane-packed)
                pl.BlockSpec((H, GH), lambda i: (0, 0)),            # W_q^T lane-tiled (resident)
                pl.BlockSpec((1, GH), lambda i: (0, 0)),            # b_q lane-tiled
                pl.BlockSpec((GH, GH), lambda i: (0, 0)),           # W_ref^T block-diag (resident)
                pl.BlockSpec((1, GH), lambda i: (0, 0)),            # b_ref lane-tiled
                pl.BlockSpec((GH, GH), lambda i: (0, 0)),           # v block-expanded
                pl.BlockSpec((G, GH), lambda i: (0, 0)),            # -inf * block-expansion
            ],
            out_specs=pl.BlockSpec((bt, GH), lambda i: (i, 0)),
        ),
        compiler_params=pltpu.CompilerParams(
            dimension_semantics=("parallel",),
            vmem_limit_bytes=int(vmem_limit_bytes),
        ),
    )(q_c, refp, maskp, wq_tp, bq_p, wref_bd, bref_p, v_bd, neg_inf_expand)

    # Fold the G lane blocks back into H (tiny wrapper-side reduction).
    d = out.reshape(B_pad, G, H).sum(axis=1)
    return d[:B]


def glimpse_ref(q, ref, mask, wq, bq, wref, bref, v, *, inf=1e8, temp=1.0):
    """Pure-JAX reference mirroring the PyTorch forward."""
    u1 = q @ wq.T + bq                                               # (B, H)
    u2 = jnp.einsum('bsh,ch->bcs', ref, wref) + bref[None, :, None]  # (B, H, S)
    u = jnp.einsum('h,bhs->bs', v, jnp.tanh(u1[:, :, None] + u2))    # (B, S)
    u = u - inf * mask
    a = jax.nn.softmax(u / temp, axis=1)                             # (B, S)
    d = jnp.einsum('bhs,bs->bh', u2, a)                              # (B, H)
    return d


if __name__ == "__main__":
    B, S, H = 2, 8, 32
    key = jax.random.PRNGKey(0)
    kq, kr, km, k1, k2, k3, k4, k5 = jax.random.split(key, 8)

    q = jax.random.normal(kq, (B, H), dtype=jnp.float32)
    ref = jax.random.normal(kr, (B, S, H), dtype=jnp.float32)
    mask = (jax.random.uniform(km, (B, S)) < 0.25).astype(jnp.float32)

    # deterministic synthetic parameters (shapes from the module's __init__)
    wq = 0.1 * jax.random.normal(k1, (H, H), dtype=jnp.float32)    # W_q.weight
    bq = 0.1 * jax.random.normal(k2, (H,), dtype=jnp.float32)      # W_q.bias
    wref = 0.1 * jax.random.normal(k3, (H, H), dtype=jnp.float32)  # W_ref.weight[:, :, 0]
    bref = 0.1 * jax.random.normal(k4, (H,), dtype=jnp.float32)    # W_ref.bias
    v = 0.1 * jax.random.normal(k5, (H,), dtype=jnp.float32)       # self.v

    out = glimpse(q, ref, mask, wq, bq, wref, bref, v, inf=1e8, temp=1.0)
    out = jax.block_until_ready(out)
    assert out.shape == (B, H)

    # Reference computed with the same bf16 quantization the kernel applies to
    # q / ref / W_q / W_ref / v (biases, mask and all accumulation stay f32).
    def q16(x):
        return x.astype(jnp.bfloat16).astype(jnp.float32)

    expected = glimpse_ref(q16(q), q16(ref), mask, q16(wq), bq, q16(wref), bref,
                           q16(v), inf=1e8, temp=1.0)
    err = float(jnp.max(jnp.abs(out - expected)))
    # Tolerance covers the documented bf16 casts (tanh output, mask bias).
    assert jnp.allclose(out, expected, atol=2e-2, rtol=2e-2), f"max abs err {err}"
    print("KERNEL_OK")
</pallas_src>

<mosaic_0001>
module attributes {stable_mosaic.version = 11 : i64} {
  func.func @glimpse_kernel(%arg0: i32, %arg1: memref<2x32xbf16, #tpu.memory_space<vmem>>, %arg2: memref<2x8x128xbf16, #tpu.memory_space<vmem>>, %arg3: memref<2x8x4xbf16, #tpu.memory_space<vmem>>, %arg4: memref<32x128xbf16, #tpu.memory_space<vmem>>, %arg5: memref<1x128xf32, #tpu.memory_space<vmem>>, %arg6: memref<128x128xbf16, #tpu.memory_space<vmem>>, %arg7: memref<1x128xf32, #tpu.memory_space<vmem>>, %arg8: memref<128x128xbf16, #tpu.memory_space<vmem>>, %arg9: memref<4x128xbf16, #tpu.memory_space<vmem>>, %arg10: memref<2x128xf32, #tpu.memory_space<vmem>>) attributes {dimension_semantics = [#tpu.dimension_semantics<parallel>], iteration_bounds = array<i64: 1>, scalar_prefetch = 0 : i64, scratch_operands = 0 : i64, tpu.core_type = #tpu.core_type<tc>, window_params = [{transform_indices = @transform_0, window_bounds = array<i64: 2, 32>}, {transform_indices = @transform_1, window_bounds = array<i64: 2, 8, 128>}, {transform_indices = @transform_2, window_bounds = array<i64: 2, 8, 4>}, {pipeline_mode = #tpu.pipeline_mode<synchronous>, transform_indices = @transform_3, window_bounds = array<i64: 32, 128>}, {pipeline_mode = #tpu.pipeline_mode<synchronous>, transform_indices = @transform_4, window_bounds = array<i64: 1, 128>}, {pipeline_mode = #tpu.pipeline_mode<synchronous>, transform_indices = @transform_5, window_bounds = array<i64: 128, 128>}, {pipeline_mode = #tpu.pipeline_mode<synchronous>, transform_indices = @transform_6, window_bounds = array<i64: 1, 128>}, {pipeline_mode = #tpu.pipeline_mode<synchronous>, transform_indices = @transform_7, window_bounds = array<i64: 128, 128>}, {pipeline_mode = #tpu.pipeline_mode<synchronous>, transform_indices = @transform_8, window_bounds = array<i64: 4, 128>}, {transform_indices = @transform_9, window_bounds = array<i64: 2, 128>}]} {
    %c0 = arith.constant 0 : index
    %c0_0 = arith.constant 0 : index
    %0 = vector.load %arg1[%c0, %c0_0] : memref<2x32xbf16, #tpu.memory_space<vmem>>, vector<2x32xbf16>
    %c0_1 = arith.constant 0 : index
    %c0_2 = arith.constant 0 : index
    %1 = vector.load %arg4[%c0_1, %c0_2] : memref<32x128xbf16, #tpu.memory_space<vmem>>, vector<32x128xbf16>
    %cst = arith.constant dense<0.000000e+00> : vector<2x128xf32>
    %2 = tpu.matmul %0, %1, %cst {dimension_numbers = #tpu.dot_dimension_numbers<[1], [0], [0], [1], [0, 0, 1, 1], [], []>} : vector<2x32xbf16>, vector<32x128xbf16>, vector<2x128xf32> -> vector<2x128xf32>
    %c0_3 = arith.constant 0 : index
    %c0_4 = arith.constant 0 : index
    %3 = vector.load %arg5[%c0_3, %c0_4] : memref<1x128xf32, #tpu.memory_space<vmem>>, vector<1x128xf32>
    %4 = vector.broadcast %3 : vector<1x128xf32> to vector<2x128xf32>
    %5 = arith.addf %2, %4 : vector<2x128xf32>
    %c0_5 = arith.constant 0 : index
    %c0_6 = arith.constant 0 : index
    %c0_7 = arith.constant 0 : index
    %6 = vector.load %arg2[%c0_5, %c0_6, %c0_7] : memref<2x8x128xbf16, #tpu.memory_space<vmem>>, vector<2x8x128xbf16>
    %7 = vector.shape_cast %6 : vector<2x8x128xbf16> to vector<16x128xbf16>
    %c0_8 = arith.constant 0 : index
    %c0_9 = arith.constant 0 : index
    %8 = vector.load %arg6[%c0_8, %c0_9] : memref<128x128xbf16, #tpu.memory_space<vmem>>, vector<128x128xbf16>
    %cst_10 = arith.constant dense<0.000000e+00> : vector<16x128xf32>
    %9 = tpu.matmul %7, %8, %cst_10 {dimension_numbers = #tpu.dot_dimension_numbers<[1], [0], [0], [1], [0, 0, 1, 1], [], []>} : vector<16x128xbf16>, vector<128x128xbf16>, vector<16x128xf32> -> vector<16x128xf32>
    %10 = vector.shape_cast %9 : vector<16x128xf32> to vector<2x8x128xf32>
    %c0_11 = arith.constant 0 : index
    %c0_12 = arith.constant 0 : index
    %11 = vector.load %arg7[%c0_11, %c0_12] : memref<1x128xf32, #tpu.memory_space<vmem>>, vector<1x128xf32>
    %12 = vector.shape_cast %11 : vector<1x128xf32> to vector<1x1x128xf32>
    %13 = vector.broadcast %12 : vector<1x1x128xf32> to vector<2x8x128xf32>
    %14 = arith.addf %10, %13 : vector<2x8x128xf32>
    %15 = vector.shape_cast %5 : vector<2x128xf32> to vector<2x1x128xf32>
    %16 = vector.broadcast %15 : vector<2x1x128xf32> to vector<2x8x128xf32>
    %17 = arith.addf %16, %14 : vector<2x8x128xf32>
    %18 = math.tanh %17 : vector<2x8x128xf32>
    %19 = arith.truncf %18 : vector<2x8x128xf32> to vector<2x8x128xbf16>
    %20 = vector.shape_cast %19 : vector<2x8x128xbf16> to vector<16x128xbf16>
    %c0_13 = arith.constant 0 : index
    %c0_14 = arith.constant 0 : index
    %21 = vector.load %arg8[%c0_13, %c0_14] : memref<128x128xbf16, #tpu.memory_space<vmem>>, vector<128x128xbf16>
    %cst_15 = arith.constant dense<0.000000e+00> : vector<16x128xf32>
    %22 = tpu.matmul %20, %21, %cst_15 {dimension_numbers = #tpu.dot_dimension_numbers<[1], [0], [0], [1], [0, 0, 1, 1], [], []>} : vector<16x128xbf16>, vector<128x128xbf16>, vector<16x128xf32> -> vector<16x128xf32>
    %23 = vector.shape_cast %22 : vector<16x128xf32> to vector<2x8x128xf32>
    %c0_16 = arith.constant 0 : index
    %c0_17 = arith.constant 0 : index
    %c0_18 = arith.constant 0 : index
    %24 = vector.load %arg3[%c0_16, %c0_17, %c0_18] : memref<2x8x4xbf16, #tpu.memory_space<vmem>>, vector<2x8x4xbf16>
    %25 = vector.shape_cast %24 : vector<2x8x4xbf16> to vector<16x4xbf16>
    %c0_19 = arith.constant 0 : index
    %c0_20 = arith.constant 0 : index
    %26 = vector.load %arg9[%c0_19, %c0_20] : memref<4x128xbf16, #tpu.memory_space<vmem>>, vector<4x128xbf16>
    %cst_21 = arith.constant dense<0.000000e+00> : vector<16x128xf32>
    %27 = tpu.matmul %25, %26, %cst_21 {dimension_numbers = #tpu.dot_dimension_numbers<[1], [0], [0], [1], [0, 0, 1, 1], [], []>} : vector<16x4xbf16>, vector<4x128xbf16>, vector<16x128xf32> -> vector<16x128xf32>
    %28 = vector.shape_cast %27 : vector<16x128xf32> to vector<2x8x128xf32>
    %29 = arith.addf %23, %28 : vector<2x8x128xf32>
    %cst_22 = arith.constant 1.000000e+00 : f32
    %30 = vector.broadcast %cst_22 : f32 to vector<2x8x128xf32>
    %31 = arith.mulf %29, %30 : vector<2x8x128xf32>
    %cst_23 = arith.constant dense<0xFF800000> : vector<2x8xf32>
    %32 = vector.multi_reduction <maximumf>, %31, %cst_23 [2] : vector<2x8x128xf32> to vector<2x8xf32>
    %33 = vector.shape_cast %32 : vector<2x8xf32> to vector<2x8x1xf32>
    %cst_24 = arith.constant dense<0xFF800000> : vector<2x1xf32>
    %34 = vector.multi_reduction <maximumf>, %33, %cst_24 [1] : vector<2x8x1xf32> to vector<2x1xf32>
    %35 = vector.shape_cast %34 : vector<2x1xf32> to vector<2x1x1xf32>
    %36 = vector.broadcast %35 : vector<2x1x1xf32> to vector<2x8x128xf32>
    %37 = arith.subf %31, %36 : vector<2x8x128xf32>
    %38 = math.exp %37 : vector<2x8x128xf32>
    %cst_25 = arith.constant dense<0.000000e+00> : vector<2x8xf32>
    %39 = vector.multi_reduction <add>, %38, %cst_25 [2] : vector<2x8x128xf32> to vector<2x8xf32>
    %40 = vector.shape_cast %39 : vector<2x8xf32> to vector<2x8x1xf32>
    %cst_26 = arith.constant dense<0.000000e+00> : vector<2x1xf32>
    %41 = vector.multi_reduction <add>, %40, %cst_26 [1] : vector<2x8x1xf32> to vector<2x1xf32>
    %42 = vector.shape_cast %41 : vector<2x1xf32> to vector<2x1x1xf32>
    %cst_27 = arith.constant 3.200000e+01 : f32
    %43 = vector.broadcast %cst_27 : f32 to vector<2x1x1xf32>
    %44 = arith.divf %43, %42 : vector<2x1x1xf32>
    %45 = vector.broadcast %44 : vector<2x1x1xf32> to vector<2x8x128xf32>
    %46 = arith.mulf %38, %45 : vector<2x8x128xf32>
    %47 = arith.mulf %46, %14 : vector<2x8x128xf32>
    %cst_28 = arith.constant dense<0.000000e+00> : vector<2x128xf32>
    %48 = vector.multi_reduction <add>, %47, %cst_28 [1] : vector<2x8x128xf32> to vector<2x128xf32>
    %c0_29 = arith.constant 0 : index
    %c0_30 = arith.constant 0 : index
    %49 = vector.load %arg10[%c0_29, %c0_30] : memref<2x128xf32, #tpu.memory_space<vmem>>, vector<2x128xf32>
    tpu.vector_store %arg10[%c0_29, %c0_30], %48 {strides = array<i32>} : memref<2x128xf32, #tpu.memory_space<vmem>>, vector<2x128xf32>,
    return
  }
  func.func @transform_0(%arg0: i32) -> (i32, i32) {
    %c0_i32 = arith.constant 0 : i32
    %c0_i32_0 = arith.constant 0 : i32
    return %arg0, %c0_i32 : i32, i32
  }
  func.func @transform_1(%arg0: i32) -> (i32, i32, i32) {
    %c0_i32 = arith.constant 0 : i32
    %c0_i32_0 = arith.constant 0 : i32
    %c0_i32_1 = arith.constant 0 : i32
    return %arg0, %c0_i32, %c0_i32_0 : i32, i32, i32
  }
  func.func @transform_2(%arg0: i32) -> (i32, i32, i32) {
    %c0_i32 = arith.constant 0 : i32
    %c0_i32_0 = arith.constant 0 : i32
    %c0_i32_1 = arith.constant 0 : i32
    return %arg0, %c0_i32, %c0_i32_0 : i32, i32, i32
  }
  func.func @transform_3(%arg0: i32) -> (i32, i32) {
    %c0_i32 = arith.constant 0 : i32
    %c0_i32_0 = arith.constant 0 : i32
    %c0_i32_1 = arith.constant 0 : i32
    return %c0_i32, %c0_i32_0 : i32, i32
  }
  func.func @transform_4(%arg0: i32) -> (i32, i32) {
    %c0_i32 = arith.constant 0 : i32
    %c0_i32_0 = arith.constant 0 : i32
    %c0_i32_1 = arith.constant 0 : i32
    return %c0_i32, %c0_i32_0 : i32, i32
  }
  func.func @transform_5(%arg0: i32) -> (i32, i32) {
    %c0_i32 = arith.constant 0 : i32
    %c0_i32_0 = arith.constant 0 : i32
    %c0_i32_1 = arith.constant 0 : i32
    return %c0_i32, %c0_i32_0 : i32, i32
  }
  func.func @transform_6(%arg0: i32) -> (i32, i32) {
    %c0_i32 = arith.constant 0 : i32
    %c0_i32_0 = arith.constant 0 : i32
    %c0_i32_1 = arith.constant 0 : i32
    return %c0_i32, %c0_i32_0 : i32, i32
  }
  func.func @transform_7(%arg0: i32) -> (i32, i32) {
    %c0_i32 = arith.constant 0 : i32
    %c0_i32_0 = arith.constant 0 : i32
    %c0_i32_1 = arith.constant 0 : i32
    return %c0_i32, %c0_i32_0 : i32, i32
  }
  func.func @transform_8(%arg0: i32) -> (i32, i32) {
    %c0_i32 = arith.constant 0 : i32
    %c0_i32_0 = arith.constant 0 : i32
    %c0_i32_1 = arith.constant 0 : i32
    return %c0_i32, %c0_i32_0 : i32, i32
  }
  func.func @transform_9(%arg0: i32) -> (i32, i32) {
    %c0_i32 = arith.constant 0 : i32
    %c0_i32_0 = arith.constant 0 : i32
    return %arg0, %c0_i32 : i32, i32
  }
}

</mosaic_0001>

<bundles_post_ra>
// kernel: tpu_custom_call.1
= control target key start
LH: loop header
LB: loop body
LE: loop exit
PB: predicated region body
PF: predicated region fallthrough
CT: control target
= control target key end

     0   :  { %14 = vsyncpa [#allocation3], 0  ;;  %s1251_s0 = inlined_call_operand.hbm [shape: bf16[2,32], index: 0, kind: input, shape index: {}]   ;;  %s1252_s1 = inlined_call_operand.hbm [shape: bf16[2,8,128], index: 1, kind: input, shape index: {}]   ;;  %s1253_s2 = inlined_call_operand.hbm [shape: bf16[2,8,4], index: 2, kind: input, shape index: {}]   ;;  %s1254_s3 = inlined_call_operand.hbm [shape: bf16[32,128], index: 3, kind: input, shape index: {}]   ;;  %s1255_s4 = inlined_call_operand.hbm [shape: f32[1,128], index: 4, kind: input, shape index: {}]   ;;  %s1256_s5 = inlined_call_operand.hbm [shape: bf16[128,128], index: 5, kind: input, shape index: {}]   ;;  %s1257_s6 = inlined_call_operand.hbm [shape: f32[1,128], index: 6, kind: input, shape index: {}]   ;;  %s1258_s7 = inlined_call_operand.hbm [shape: bf16[128,128], index: 7, kind: input, shape index: {}]   ;;  %s1259_s8 = inlined_call_operand.hbm [shape: bf16[4,128], index: 8, kind: input, shape index: {}]   ;;  %s1260_s9 = inlined_call_operand.hbm [shape: f32[2,128], index: 9, kind: output, shape index: {}]  }
   0x1   :  { %15 = vsyncpa [#allocation6], 0 }
   0x2   :  { %16 = vsyncpa [#allocation9], 0 }
   0x3   :  { %17 = vsyncpa [#allocation12], 0 }
   0x4   :  { %18 = vsyncpa [#allocation15], 0 }
   0x5   :  { %19 = vsyncpa [#allocation4], 0  ;;  %s1016_s30 = smov [#allocation5]   ;;  %s784_s13 = scalar_lea.hbm %s1252_s1, 128 }
   0x6   :  { %s35_s10 = sshll.u32 %s1016_s30, 4  ;;  %p785_p0 = scmp.ne.s32.totalorder %s1252_s1, %s784_s13  ;;  %s36_s10 = int_to_ptr.vmem [resolvable:$true] %s35_s10 }
   0x7   :  { %p788_p1 = scmp.lt.u32.totalorder %s784_s13, %s1252_s1 }
   0x9   :  { %p790_p2 = pnand %p788_p1, %p785_p0 }
   0xb   :  { %793 = shalt.err (!%p790_p2)
}
   0xc   :  { %s794_s18 = scalar_lea.vmem %s36_s10, 128  ;;  %p799_p4 = scmp.lt.s32.totalorder %s36_s10, %s36_s10 }
   0xd   :  { %p795_p3 = scmp.ne.s32.totalorder %s36_s10, %s794_s18  ;;  %p800_p5 = scmp.lt.s32.totalorder %s794_s18, %s794_s18 }
   0xf   :  { %p801_p6 = por %p800_p5, %p799_p4 }
  0x11   :  { %p802_p7 = pnand %p801_p6, %p795_p3 }
  0x13   :  { %805 = shalt.err (!%p802_p7)
}
  0x14   :  { %s1017_s19 = smov 64   ;;  %s1018_s20 = smov 4  }
  0x15   :  { %41 = dma.hbm_to_vmem [thread:$0]  %s1252_s1, 128, %s36_s10, [#allocation6], %s1017_s19, %s1017_s19, %s1018_s20  }
  0x16   :  { %s1019_s23 = smov [#allocation8]   ;;  %s1020_s25 = smov [#allocation11]  }
  0x17   :  { %s59_s24 = sshll.u32 %s1019_s23, 4  ;;  %s81_s26 = sshll.u32 %s1020_s25, 4  ;;  %s60_s24 = int_to_ptr.vmem [resolvable:$true] %s59_s24  ;;  %s82_s26 = int_to_ptr.vmem [resolvable:$true] %s81_s26 }
  0x18   :  { %s806_s29 = scalar_lea.hbm %s1254_s3, 256 }
  0x19   :  { %p807_p8 = scmp.ne.s32.totalorder %s1254_s3, %s806_s29  ;;  %p810_p9 = scmp.lt.u32.totalorder %s806_s29, %s1254_s3 }
  0x1b   :  { %p812_p10 = pnand %p810_p9, %p807_p8 }
  0x1d   :  { %815 = shalt.err (!%p812_p10)
}
  0x1e   :  { %s816_s1 = scalar_lea.vmem %s60_s24, 256  ;;  %p821_p12 = scmp.lt.s32.totalorder %s60_s24, %s60_s24 }
  0x1f   :  { %p817_p11 = scmp.ne.s32.totalorder %s60_s24, %s816_s1  ;;  %p822_p13 = scmp.lt.s32.totalorder %s816_s1, %s816_s1 }
  0x21   :  { %p823_p0 = por %p822_p13, %p821_p12 }
  0x23   :  { %p824_p1 = pnand %p823_p0, %p817_p11 }
  0x25   :  { %827 = shalt.err (!%p824_p1)
}
  0x26   :  { %65 = dma.hbm_to_vmem [thread:$0]  %s1254_s3, 256, %s60_s24, [#allocation9], %s1017_s19, %s1017_s19, %s1018_s20  }
  0x27   :  { %s828_s17 = scalar_lea.hbm %s1256_s5, 1024 }
  0x28   :  { %p829_p2 = scmp.ne.s32.totalorder %s1256_s5, %s828_s17  ;;  %p832_p3 = scmp.lt.u32.totalorder %s828_s17, %s1256_s5 }
  0x2a   :  { %p834_p4 = pnand %p832_p3, %p829_p2 }
  0x2c   :  { %837 = shalt.err (!%p834_p4)
}
  0x2d   :  { %s838_s25 = scalar_lea.vmem %s82_s26, 1024  ;;  %p843_p6 = scmp.lt.s32.totalorder %s82_s26, %s82_s26 }
  0x2e   :  { %p839_p5 = scmp.ne.s32.totalorder %s82_s26, %s838_s25  ;;  %p844_p7 = scmp.lt.s32.totalorder %s838_s25, %s838_s25 }
  0x30   :  { %p845_p8 = por %p844_p7, %p843_p6 }
  0x32   :  { %p846_p9 = pnand %p845_p8, %p839_p5 }
  0x34   :  { %849 = shalt.err (!%p846_p9)
}
  0x35   :  { %87 = dma.hbm_to_vmem [thread:$0]  %s1256_s5, 1024, %s82_s26, [#allocation12], %s1017_s19, %s1017_s19, %s1018_s20  }
  0x36   :  { %s1021_s27 = smov [#allocation14]   ;;  %s1022_s29 = smov [#allocation2]  }
  0x37   :  { %s103_s28 = sshll.u32 %s1021_s27, 4  ;;  %s26_s30 = sshll.u32 %s1022_s29, 4  ;;  %s104_s28 = int_to_ptr.vmem [resolvable:$true] %s103_s28  ;;  %s27_s30 = int_to_ptr.vmem [resolvable:$true] %s26_s30 }
  0x38   :  { %s850_s13 = scalar_lea.hbm %s1258_s7, 1024 }
  0x39   :  { %p851_p10 = scmp.ne.s32.totalorder %s1258_s7, %s850_s13  ;;  %p854_p11 = scmp.lt.u32.totalorder %s850_s13, %s1258_s7 }
  0x3b   :  { %p856_p12 = pnand %p854_p11, %p851_p10 }
  0x3d   :  { %859 = shalt.err (!%p856_p12)
}
  0x3e   :  { %s860_s5 = scalar_lea.vmem %s104_s28, 1024  ;;  %p865_p0 = scmp.lt.s32.totalorder %s104_s28, %s104_s28 }
  0x3f   :  { %p861_p13 = scmp.ne.s32.totalorder %s104_s28, %s860_s5  ;;  %p866_p1 = scmp.lt.s32.totalorder %s860_s5, %s860_s5 }
  0x41   :  { %p867_p2 = por %p866_p1, %p865_p0 }
  0x43   :  { %p868_p3 = pnand %p867_p2, %p861_p13 }
  0x45   :  { %871 = shalt.err (!%p868_p3)
}
  0x46   :  { %109 = dma.hbm_to_vmem [thread:$0]  %s1258_s7, 1024, %s104_s28, [#allocation15], %s1017_s19, %s1017_s19, %s1018_s20  }
  0x47   :  { %s872_s21 = scalar_lea.hbm %s1251_s0, 16 }
  0x48   :  { %p873_p4 = scmp.ne.s32.totalorder %s1251_s0, %s872_s21  ;;  %p876_p5 = scmp.lt.u32.totalorder %s872_s21, %s1251_s0 }
  0x4a   :  { %p878_p6 = pnand %p876_p5, %p873_p4 }
  0x4c   :  { %881 = shalt.err (!%p878_p6)
}
  0x4d   :  { %s882_s24 = scalar_lea.vmem %s27_s30, 16  ;;  %s886_s27 = scalar_lea.vmem %s27_s30, 32 }
  0x4e   :  { %p883_p7 = scmp.ne.s32.totalorder %s27_s30, %s882_s24  ;;  %p887_p8 = scmp.lt.s32.totalorder %s27_s30, %s27_s30 }
  0x4f   :  { %p888_p9 = scmp.lt.s32.totalorder %s886_s27, %s882_s24 }
  0x51   :  { %p889_p10 = por %p888_p9, %p887_p8 }
  0x53   :  { %p890_p11 = pnand %p889_p10, %p883_p7 }
  0x55   :  { %893 = shalt.err (!%p890_p11)
}
  0x56   :  { %29 = dma.hbm_to_vmem [thread:$0]  %s1251_s0, 16, %s27_s30, [#allocation3]  }
  0x57   :  { %s1023_s29 = smov [#allocation7]   ;;  %s1024_s12 = smov [#allocation10]  }
  0x58   :  { %s47_s11 = sshll.u32 %s1023_s29, 4  ;;  %s72_s13 = sshll.u32 %s1024_s12, 4  ;;  %s48_s11 = int_to_ptr.vmem [resolvable:$true] %s47_s11  ;;  %s73_s13 = int_to_ptr.vmem [resolvable:$true] %s72_s13 }
  0x59   :  { %s894_s14 = scalar_lea.hbm %s1253_s2, 128 }
  0x5a   :  { %p895_p12 = scmp.ne.s32.totalorder %s1253_s2, %s894_s14  ;;  %p898_p13 = scmp.lt.u32.totalorder %s894_s14, %s1253_s2 }
  0x5c   :  { %p900_p0 = pnand %p898_p13, %p895_p12 }
  0x5e   :  { %903 = shalt.err (!%p900_p0)
}
  0x5f   :  { %s904_s0 = scalar_lea.vmem %s48_s11, 128  ;;  %p909_p2 = scmp.lt.s32.totalorder %s48_s11, %s48_s11 }
  0x60   :  { %p905_p1 = scmp.ne.s32.totalorder %s48_s11, %s904_s0  ;;  %p910_p3 = scmp.lt.s32.totalorder %s904_s0, %s904_s0 }
  0x62   :  { %p911_p4 = por %p910_p3, %p909_p2 }
  0x64   :  { %p912_p5 = pnand %p911_p4, %p905_p1 }
  0x66   :  { %915 = shalt.err (!%p912_p5)
}
  0x67   :  { %53 = dma.hbm_to_vmem [thread:$0]  %s1253_s2, 128, %s48_s11, [#allocation6], %s1017_s19, %s1017_s19, %s1018_s20  }
  0x68   :  { %s916_s22 = scalar_lea.hbm %s1255_s4, 16 }
  0x69   :  { %p917_p6 = scmp.ne.s32.totalorder %s1255_s4, %s916_s22  ;;  %p920_p7 = scmp.lt.u32.totalorder %s916_s22, %s1255_s4 }
  0x6b   :  { %p922_p8 = pnand %p920_p7, %p917_p6 }
  0x6d   :  { %925 = shalt.err (!%p922_p8)
}
  0x6e   :  { %s926_s27 = scalar_lea.vmem %s73_s13, 16  ;;  %s930_s7 = scalar_lea.vmem %s73_s13, 32 }
  0x6f   :  { %p927_p9 = scmp.ne.s32.totalorder %s73_s13, %s926_s27  ;;  %p931_p10 = scmp.lt.s32.totalorder %s73_s13, %s73_s13 }
  0x70   :  { %p932_p11 = scmp.lt.s32.totalorder %s930_s7, %s926_s27 }
  0x72   :  { %p933_p12 = por %p932_p11, %p931_p10 }
  0x74   :  { %p934_p13 = pnand %p933_p12, %p927_p9 }
  0x76   :  { %937 = shalt.err (!%p934_p13)
}
  0x77   :  { %75 = dma.hbm_to_vmem [thread:$0]  %s1255_s4, 16, %s73_s13, [#allocation9]  }
  0x78   :  { %s1025_s20 = smov [#allocation13]   ;;  %s1026_s29 = smov [#allocation16]  }
  0x79   :  { %s94_s28 = sshll.u32 %s1025_s20, 4  ;;  %s116_s11 = sshll.u32 %s1026_s29, 4  ;;  %s95_s28 = int_to_ptr.vmem [resolvable:$true] %s94_s28  ;;  %s117_s11 = int_to_ptr.vmem [resolvable:$true] %s116_s11 }
  0x7a   :  { %s938_s10 = scalar_lea.hbm %s1257_s6, 16 }
  0x7b   :  { %p939_p0 = scmp.ne.s32.totalorder %s1257_s6, %s938_s10  ;;  %p942_p1 = scmp.lt.u32.totalorder %s938_s10, %s1257_s6 }
  0x7d   :  { %p944_p2 = pnand %p942_p1, %p939_p0 }
  0x7f   :  { %947 = shalt.err (!%p944_p2)
}
  0x80   :  { %s948_s4 = scalar_lea.vmem %s95_s28, 16  ;;  %s952_s13 = scalar_lea.vmem %s95_s28, 32 }
  0x81   :  { %p949_p3 = scmp.ne.s32.totalorder %s95_s28, %s948_s4  ;;  %p953_p4 = scmp.lt.s32.totalorder %s95_s28, %s95_s28 }
  0x82   :  { %p954_p5 = scmp.lt.s32.totalorder %s952_s13, %s948_s4 }
  0x84   :  { %p955_p6 = por %p954_p5, %p953_p4 }
  0x86   :  { %p956_p7 = pnand %p955_p6, %p949_p3 }
  0x88   :  { %959 = shalt.err (!%p956_p7)
}
  0x89   :  { %97 = dma.hbm_to_vmem [thread:$0]  %s1257_s6, 16, %s95_s28, [#allocation12]  }
  0x8a   :  { %s960_s18 = scalar_lea.hbm %s1259_s8, 32 }
  0x8b   :  { %p961_p8 = scmp.ne.s32.totalorder %s1259_s8, %s960_s18  ;;  %p964_p9 = scmp.lt.u32.totalorder %s960_s18, %s1259_s8 }
  0x8d   :  { %p966_p10 = pnand %p964_p9, %p961_p8 }
  0x8f   :  { %969 = shalt.err (!%p966_p10)
}
  0x90   :  { %s970_s3 = scalar_lea.vmem %s117_s11, 32  ;;  %p975_p12 = scmp.lt.s32.totalorder %s117_s11, %s117_s11 }
  0x91   :  { %p971_p11 = scmp.ne.s32.totalorder %s117_s11, %s970_s3  ;;  %p976_p13 = scmp.lt.s32.totalorder %s970_s3, %s970_s3 }
  0x93   :  { %p977_p0 = por %p976_p13, %p975_p12 }
  0x95   :  { %p978_p1 = pnand %p977_p0, %p971_p11 }
  0x97   :  { %981 = shalt.err (!%p978_p1)
}
  0x98   :  { %119 = dma.hbm_to_vmem [thread:$0]  %s1259_s8, 32, %s117_s11, [#allocation15]  }
  0x99   :  { %1004 = dma.done.wait [#allocation3], 16  }
  0x9a   :  { %1005 = vsyncadd [#allocation3], 4294967280 }
  0x9b   :  { %1006 = dma.done.wait [#allocation6], 256  }
  0x9c   :  { %1007 = vsyncadd [#allocation6], 4294967040 }
  0x9d   :  { %1008 = dma.done.wait [#allocation9], 272  }
  0x9e   :  { %1009 = vsyncadd [#allocation9], 4294967024 }
  0x9f   :  { %1010 = dma.done.wait [#allocation12], 1040  }
  0xa0   :  { %1011 = vsyncadd [#allocation12], 4294966256 }
  0xa1   :  { %1012 = dma.done.wait [#allocation15], 1056  }
  0xa2   :  { %1013 = vsyncadd [#allocation15], 4294966240  ;;  %v1027_v0 = vmov 0.0   ;;  %vm1028_vm0 = vmmov 0   ;;  %v752_v1 = vld [vmem:[#allocation8] sm:$0xff]   ;;  %v753_v2 = vld [vmem:[#allocation8 + $0x8] sm:$0xff]   ;;  %v342_v27 = vlaneseq }
  0xa3   :  { %679 = vmatprep.subr.bf16.mxu1 %v1027_v0  ;;  %683 = vmatprep.mubr.msk.bf16.mxu1 %vm1028_vm0, %v1027_v0  ;;  %v148_v3 = vld [vmem:[#allocation2] sm:$0x1]  ;;  %vm172_vm1 = vcmask 261120   ;;  %v754_v4 = vld [vmem:[#allocation11] sm:$0xff]   ;;  %v755_v5 = vld [vmem:[#allocation11 + $0x8] sm:$0xff]   ;;  %vm500_vm2 = vcmask 1041408  }
  0xa4   :  { %707 = vmatprep.subr.bf16.mxu0 %v1027_v0  ;;  %723 = vmatprep.mubr.msk.bf16.mxu0 %vm1028_vm0, %v1027_v0  ;;  %v756_v6 = vld [vmem:[#allocation11 + $0x10] sm:$0xff]   ;;  %v757_v7 = vld [vmem:[#allocation11 + $0x18] sm:$0xff]   ;;  %v758_v8 = vld [vmem:[#allocation11 + $0x20] sm:$0xff]   ;;  %v1029_v25 = vmov 1966171168   ;;  %v343_v29 = vshrl.u32 %v342_v27, 7 }
  0xa5   :  { %680 = vmatpush3.bf16.msra.mxu1 %v752_v1  ;;  %v759_v9 = vld [vmem:[#allocation11 + $0x28] sm:$0xff]   ;;  %v760_v10 = vld [vmem:[#allocation11 + $0x30] sm:$0xff]   ;;  %v761_v11 = vld [vmem:[#allocation11 + $0x38] sm:$0xff]   ;;  %v340_v26 = vunpack.c.l.s4 %v1029_v25  ;;  %vm496_vm3 = vcmask 31744   ;;  %s1030_s8 = smov [#allocation17]   ;;  %vm607_vm4 = vcmask 1041409  }
  0xa6   :  { %681 = vmatprep.subr.bf16.mxu1 %v1027_v0  ;;  %v762_v12 = vld [vmem:[#allocation5] sm:$0xff]   ;;  %v764_v14 = vld [vmem:[#allocation14 + $0x8] sm:$0xff]   ;;  %v765_v15 = vld [vmem:[#allocation14 + $0x10] sm:$0xff]   ;;  %v363_v36 = vsub.s32 0, %v343_v29  ;;  %s617_s27 = sshll.u32 %s1030_s8, 4  ;;  %s618_s27 = int_to_ptr.vmem [resolvable:$true] %s617_s27 }
  0xa7   :  { %v763_v13 = vld [vmem:[#allocation14] sm:$0xff]   ;;  %v766_v16 = vld [vmem:[#allocation14 + $0x18] sm:$0xff]   ;;  %v768_v18 = vld [vmem:[#allocation14 + $0x28] sm:$0xff]   ;;  %v341_v28 = vunpack.c.0.s8 %v340_v26  ;;  %s982_s7 = scalar_lea.vmem %s618_s27, 32  ;;  %p987_p3 = scmp.lt.s32.totalorder %s618_s27, %s618_s27 }
  0xa8   :  { %708 = vmatpush3.bf16.msra.mxu0 %v763_v13  ;;  %v767_v17 = vld [vmem:[#allocation14 + $0x20] sm:$0xff]   ;;  %v769_v19 = vld [vmem:[#allocation14 + $0x30] sm:$0xff]   ;;  %v770_v20 = vld [vmem:[#allocation14 + $0x38] sm:$0xff]   ;;  %p983_p2 = scmp.ne.s32.totalorder %s618_s27, %s982_s7  ;;  %p988_p4 = scmp.lt.s32.totalorder %s982_s7, %s982_s7 }
  0xa9   :  { %682 = vmatpush3.bf16.msra.mxu1 %v753_v2  ;;  %709 = vmatprep.subr.bf16.mxu0 %v1027_v0  ;;  %v630_v30 = vld [vmem:[#allocation10] ss:$0 sm:$0xff]  ;;  %v344_v32 = vsub.s32 %v341_v28, %v343_v29  ;;  %v643_v37 = vld [vmem:[#allocation13] ss:$0 sm:$0xff]  ;;  %v490_v49 = vld [vmem:[#allocation16] sm:$0x3] }
  0xaa   :  { %687 = vmatprep.subr.bf16.mxu1 %v1027_v0  ;;  %v502_v53 = vsel %vm500_vm2, %v490_v49, 0  ;;  %v771_v54 = vld [vmem:[#allocation7] sm:$0xff]   ;;  %p989_p5 = por %p988_p4, %p987_p3 }
  0xac   :  { %684 = vmatmul.mubr.msk.bf16.vlgmr.msra.gmra.mrb[0].mxu1 %vm172_vm1, %v148_v3  ;;  %710 = vmatpush3.bf16.msra.mxu0 %v764_v14  ;;  %p990_p6 = pnand %p989_p5, %p983_p2 }
  0xad   :  { %688 = vmatpush3.bf16.msra.mxu1 %v754_v4  ;;  %703 = vmatprep.mubr.msk.bf16.mxu1 %vm1028_vm0, %v1027_v0 }
  0xae   :  { %689 = vmatprep.subr.bf16.mxu1 %v1027_v0  ;;  %711 = vmatprep.subr.bf16.mxu0 %v1027_v0 }
  0xb0   :  { %712 = vmatpush3.bf16.msra.mxu0 %v765_v15 }
  0xb1   :  { %690 = vmatpush3.bf16.msra.mxu1 %v755_v5  ;;  %713 = vmatprep.subr.bf16.mxu0 %v1027_v0 }
  0xb2   :  { %691 = vmatprep.subr.bf16.mxu1 %v1027_v0 }
  0xb4   :  { %714 = vmatpush3.bf16.msra.mxu0 %v766_v16 }
  0xb5   :  { %692 = vmatpush3.bf16.msra.mxu1 %v756_v6  ;;  %715 = vmatprep.subr.bf16.mxu0 %v1027_v0 }
  0xb6   :  { %693 = vmatprep.subr.bf16.mxu1 %v1027_v0 }
  0xb8   :  { %716 = vmatpush3.bf16.msra.mxu0 %v767_v17 }
  0xb9   :  { %694 = vmatpush3.bf16.msra.mxu1 %v757_v7  ;;  %717 = vmatprep.subr.bf16.mxu0 %v1027_v0 }
  0xba   :  { %695 = vmatprep.subr.bf16.mxu1 %v1027_v0 }
  0xbc   :  { %718 = vmatpush3.bf16.msra.mxu0 %v768_v18 }
  0xbd   :  { %696 = vmatpush3.bf16.msra.mxu1 %v758_v8  ;;  %719 = vmatprep.subr.bf16.mxu0 %v1027_v0 }
  0xbe   :  { %697 = vmatprep.subr.bf16.mxu1 %v1027_v0 }
  0xc0   :  { %720 = vmatpush3.bf16.msra.mxu0 %v769_v19 }
  0xc1   :  { %698 = vmatpush3.bf16.msra.mxu1 %v759_v9  ;;  %721 = vmatprep.subr.bf16.mxu0 %v1027_v0 }
  0xc2   :  { %699 = vmatprep.subr.bf16.mxu1 %v1027_v0 }
  0xc4   :  { %722 = vmatpush3.bf16.msra.mxu0 %v770_v20 }
  0xc5   :  { %700 = vmatpush3.bf16.msra.mxu1 %v760_v10  ;;  %727 = vmatprep.subr.bf16.mxu0 %v1027_v0 }
  0xc6   :  { %701 = vmatprep.subr.bf16.mxu1 %v1027_v0 }
  0xc9   :  { %702 = vmatpush3.bf16.msra.mxu1 %v761_v11 }
  0xcc   :  { %704 = vmatmul.mubr.bf16.vlgmr.msra.gmra.mrb[4].mxu1 %v762_v12 }
 0x17f   :  { %v210_v21 = vpop.f32.mrb[0].mxu1 }
 0x180   :  { %v685_v22 = vpop.f32.mrb[1].mxu1  ;;  %v211_v31 = vadd.f32 %v630_v30, %v210_v21 }
 0x181   :  { %v213_v23 = vpop.f32.mrb[2].mxu1 }
 0x182   :  { %v686_v24 = vpop.f32.mrb[3].mxu1  ;;  %v345_v33 = vrot.slane %v211_v31, %v344_v32 }
 0x184   :  { %v346_v34 = vcombine.high %v345_v33, %v345_v33  ;;  %v353_v35 = vrot.slane %v345_v33, %v344_v32 }
 0x186   :  { %v360_v38 = vrot.slane %v346_v34, %v344_v32  ;;  %v364_v41 = vrot.slane %v353_v35, %v363_v36 }
 0x188   :  { %v368_v46 = vrot.slane %v360_v38, %v363_v36 }
 0x19f   :  { %v322_v39 = vpop.f32.mrb[4].mxu1 }
 0x1a0   :  { %v1229_v40 = vadd.f32 %v643_v37, %v322_v39  ;;  %v705_v42 = vpop.f32.mrb[5].mxu1 }
 0x1a1   :  { %v325_v43 = vpop.f32.mrb[6].mxu1 }
 0x1a2   :  { %v371_v44 = vadd.f32 %v364_v41, %v1229_v40  ;;  %v1232_v45 = vadd.f32 %v643_v37, %v325_v43  ;;  %v706_v47 = vpop.f32.mrb[7].mxu1 }
 0x1a4   :  { %v372_v48 = vadd.f32 %v368_v46, %v1232_v45  ;;  %772 = vtanh.f32 %v371_v44 }
 0x1a6   :  { %774 = vtanh.f32 %v372_v48 }
 0x1ae   :  { %v773_v50 = vpop.eup %772 }
 0x1b0   :  { %v775_v51 = vpop.eup %774 }
 0x1b1   :  { %v655_v52 = vpack.c.bf16 %v775_v51, %v773_v50 }
 0x1b3   :  { %724 = vmatmul.mubr.bf16.vlgmr.msra.gmra.mrb[0].mxu0 %v655_v52 }
 0x1b4   :  { %728 = vmatpush3.bf16.msra.mxu0 %v502_v53  ;;  %729 = vmatprep.mubr.msk.bf16.mxu0 %vm1028_vm0, %v1027_v0 }
 0x1bf   :  { %730 = vmatmul.mubr.msk.bf16.vlgmr.msra.gmra.mrb[0].mxu0 %vm496_vm3, %v771_v54 }
 0x292   :  { %v538_v55 = vpop.f32.mrb[0].mxu0 }
 0x293   :  { %547 = vmax.xlane.f32.xlu0 %v538_v55  ;;  %v731_v56 = vpop.f32.mrb[1].mxu0 }
 0x294   :  { %v541_v57 = vpop.f32.mrb[2].mxu0 }
 0x295   :  { %v732_v58 = vpop.f32.mrb[3].mxu0 }
 0x297   :  { %549 = vmax.xlane.f32.xlu0 %v541_v57 }
 0x320   :  { %v548_v59 = vpop.xlane.xlu0 %547 }
 0x321   :  { %v551_v60 = vrot.slane %v548_v59, 4 }
 0x323   :  { %v552_v61 = vmax.f32 %v548_v59, %v551_v60 }
 0x324   :  { %v550_v62 = vpop.xlane.xlu0 %549 }
 0x325   :  { %v553_v63 = vrot.slane %v552_v61, 2  ;;  %v557_v1 = vrot.slane %v550_v62, 4 }
 0x327   :  { %v554_v2 = vmax.f32 %v552_v61, %v553_v63  ;;  %v558_v3 = vmax.f32 %v550_v62, %v557_v1 }
 0x329   :  { %v555_v4 = vrot.slane %v554_v2, 1  ;;  %v559_v5 = vrot.slane %v558_v3, 2 }
 0x32b   :  { %v556_v0 = vmax.f32 %v554_v2, %v555_v4  ;;  %v560_v6 = vmax.f32 %v558_v3, %v559_v5 }
 0x32d   :  { %v563_v7 = vsub.f32 %v538_v55, %v556_v0  ;;  %v561_v8 = vrot.slane %v560_v6, 1 }
 0x32f   :  { %v565_v9 = vmul.f32 1.442695, %v563_v7  ;;  %v562_v10 = vmax.f32 %v560_v6, %v561_v8 }
 0x331   :  { %776 = vpow2.f32 %v565_v9  ;;  %v564_v11 = vsub.f32 %v541_v57, %v562_v10 }
 0x333   :  { %v567_v12 = vmul.f32 1.442695, %v564_v11 }
 0x335   :  { %778 = vpow2.f32 %v567_v12 }
 0x33b   :  { %v777_v13 = vpop.eup %776 }
 0x33c   :  { %569 = vadd.xlane.f32.xlu1 %v777_v13 }
 0x33f   :  { %v779_v14 = vpop.eup %778 }
 0x340   :  { %571 = vadd.xlane.f32.xlu1 %v779_v14 }
 0x3c9   :  { %v570_v15 = vpop.xlane.xlu1 %569 }
 0x3ca   :  { %v573_v16 = vrot.slane %v570_v15, 4 }
 0x3cc   :  { %v574_v17 = vadd.f32 %v573_v16, %v570_v15 }
 0x3cd   :  { %v572_v18 = vpop.xlane.xlu1 %571 }
 0x3ce   :  { %v575_v19 = vrot.slane %v574_v17, 2  ;;  %v579_v20 = vrot.slane %v572_v18, 4 }
 0x3d0   :  { %v576_v21 = vadd.f32 %v575_v19, %v574_v17  ;;  %v580_v22 = vadd.f32 %v579_v20, %v572_v18 }
 0x3d2   :  { %v577_v23 = vrot.slane %v576_v21, 1  ;;  %v581_v24 = vrot.slane %v580_v22, 2 }
 0x3d4   :  { %v578_v25 = vadd.f32 %v577_v23, %v576_v21  ;;  %v582_v26 = vadd.f32 %v581_v24, %v580_v22 }
 0x3d6   :  { %780 = vrcp.f32 %v578_v25  ;;  %v583_v27 = vrot.slane %v582_v26, 1 }
 0x3d8   :  { %v584_v28 = vadd.f32 %v583_v27, %v582_v26 }
 0x3da   :  { %782 = vrcp.f32 %v584_v28 }
 0x3e0   :  { %v781_v29 = vpop.eup %780 }
 0x3e1   :  { %v586_v30 = vmul.f32 32.0, %v781_v29 }
 0x3e3   :  { %v589_v31 = vmul.f32 %v777_v13, %v586_v30 }
 0x3e4   :  { %v783_v32 = vpop.eup %782 }
 0x3e5   :  { %v591_v33 = vmul.f32 %v589_v31, %v1229_v40  ;;  %v588_v34 = vmul.f32 32.0, %v783_v32 }
 0x3e7   :  { %v590_v35 = vmul.f32 %v779_v14, %v588_v34  ;;  %v593_v36 = vrot.slane %v591_v33, 4 }
 0x3e9   :  { %v592_v37 = vmul.f32 %v590_v35, %v1232_v45  ;;  %v594_v38 = vadd.f32 %v593_v36, %v591_v33 }
 0x3eb   :  { %v595_v39 = vrot.slane %v594_v38, 2  ;;  %v599_v41 = vrot.slane %v592_v37, 4 }
 0x3ed   :  { %v596_v42 = vadd.f32 %v595_v39, %v594_v38  ;;  %v600_v43 = vadd.f32 %v599_v41, %v592_v37 }
 0x3ef   :  { %v601_v44 = vrot.slane %v600_v43, 2  ;;  %v597_v46 = vrot.slane %v596_v42, 1 }
 0x3f1   :  { %v602_v47 = vadd.f32 %v601_v44, %v600_v43  ;;  %v598_v49 = vadd.f32 %v597_v46, %v596_v42 }
 0x3f3   :  { %v603_v48 = vrot.slane %v602_v47, 1 }
 0x3f5   :  { %v604_v50 = vadd.f32 %v603_v48, %v602_v47 }
 0x3f7   :  { %v608_v40 = vsel %vm607_vm4, %v604_v50, %v598_v49 }
 0x3f8   :  { %610 = vst [vmem:[#allocation17] sm:$0x3] %v608_v40 }
 0x3f9   :  { %993 = shalt.err (!%p990_p6)
}
 0x3fa   :  { %s994_s20 = scalar_lea.hbm %s1260_s9, 32 }
 0x3fb   :  { %p995_p7 = scmp.ne.s32.totalorder %s1260_s9, %s994_s20  ;;  %p998_p8 = scmp.lt.u32.totalorder %s994_s20, %s1260_s9 }
 0x3fd   :  { %p1000_p9 = pnand %p998_p8, %p995_p7 }
 0x3ff   :  { %1003 = shalt.err (!%p1000_p9)
}
 0x400   :  { %620 = dma.vmem_to_hbm [thread:$0]  %s618_s27, 32, %s1260_s9, [#allocation4]  }
 0x401   :  { %1014 = dma.done.wait [#allocation4], 32  }
 0x402   :  { %1015 = vsyncadd [#allocation4], 4294967264 }
 0x403   :  { %624 = vsyncpa [#allocation3], 1 }
 0x404   :  { %625 = vsyncpa [#allocation6], 1 }
 0x405   :  { %626 = vsyncpa [#allocation9], 1 }
 0x406   :  { %627 = vsyncpa [#allocation12], 1 }
 0x407   :  { %628 = vsyncpa [#allocation15], 1 }
 0x408   :  { %629 = vsyncpa [#allocation4], 1 }

</bundles_post_ra>
